<compile_context>
chip_gen: v5e
topology: v5e:2x2
jax: 0.10.0
libtpu: 0.0.40
codegen_flags: <defaults>
</compile_context>

<pallas_src>
import jax
import jax.numpy as jnp
import numpy as np
from jax import lax
from jax.experimental import pallas as pl
from jax.experimental.pallas import tpu as pltpu

_LANE = 128


def _round_up(x, m):
    return ((x + m - 1) // m) * m


def _sublane_quantum(dtype):
    # f32 -> 8, bf16/f16 -> 16, int8/fp8 -> 32 (sub-32-bit packs along sublanes)
    bits = jnp.dtype(dtype).itemsize * 8
    return 8 * max(32 // max(bits, 1), 1)


def _pick_tile(dim, preferred, quantum):
    """Largest t <= preferred with dim % t == 0 and t % quantum == 0.

    `dim` must already be a multiple of `quantum` (we pad before calling)."""
    t = min(preferred, dim)
    t = (t // quantum) * quantum
    while t > quantum:
        if dim % t == 0:
            return t
        t -= quantum
    return quantum


def _default_vmem_limit():
    cap = 64 * 1024 * 1024
    try:
        info = pltpu.get_tpu_info()
        cap = int(getattr(info, "vmem_capacity_bytes", cap))
    except Exception:
        pass
    # 3/4 of physical VMEM, capped: ~48 MiB on v7x (64 MiB/TC), ~96 MiB on
    # v5e/v6e (128 MiB) -- leaves headroom for compiler scratch.
    return max(32 * 1024 * 1024, min(cap * 3 // 4, 112 * 1024 * 1024))


def prepare_qkv_lora_params(weight, bias, lora_As, lora_Bs):
    """One-time layout work (module init / adapter-set change).

    weight:  [D, K]  (PyTorch nn.Linear layout)
    bias:    [D]
    lora_As: [I, K, R]
    lora_Bs: [I, R, D]

    Builds the fused, K-major RHS  W_aug = [ W^T ; lora_Bs.reshape(I*R, D) ]
    zero-padded so the contraction depth and output width are 128-multiples.
    Done OUTSIDE the per-call forward so the full weight is never transposed or
    re-laid-out per call.
    """
    D, K = weight.shape
    I, Ka, R = lora_As.shape
    assert Ka == K and lora_Bs.shape == (I, R, D)
    IR = I * R
    K_aug = _round_up(K + IR, _LANE)
    D_pad = _round_up(D, _LANE)

    w_aug = jnp.concatenate(
        [jnp.swapaxes(weight, 0, 1),            # [K, D]  (transpose once, here)
         lora_Bs.reshape(IR, D)], axis=0)       # [K+IR, D]
    w_aug = jnp.pad(w_aug, ((0, K_aug - (K + IR)), (0, D_pad - D)))
    bias2d = jnp.pad(bias.reshape(1, D).astype(jnp.float32),
                     ((0, 0), (0, D_pad - D)))
    return dict(w_aug=w_aug, bias2d=bias2d, lora_As=lora_As,
                K=K, IR=IR, K_aug=K_aug, D=D, D_pad=D_pad)


def qkv_lora_column_parallel_linear(x, adapter_mapping, params, *,
                                    tile_n=512, tile_b=256, tile_k=512,
                                    vmem_limit_bytes=None):
    """Returns (output, output_bias) like the PyTorch module (output_bias=None).

    x:               [B, K]
    adapter_mapping: [B, I]
    params:          from prepare_qkv_lora_params
    """
    B, K = x.shape
    assert K == params["K"]
    lora_As = params["lora_As"]
    I = lora_As.shape[0]
    assert adapter_mapping.shape == (B, I)
    IR, K_aug = params["IR"], params["K_aug"]
    D, D_pad = params["D"], params["D_pad"]
    w_aug, bias2d = params["w_aug"], params["bias2d"]

    f32_path = (x.dtype == jnp.float32) and (w_aug.dtype == jnp.float32)
    precision = lax.Precision.HIGHEST if f32_path else None

    # ---- per-call prep (small: O(B*(K + I*R)) work, no weight traffic) ------
    # LoRA A-projection, scaled by adapter_mapping, appended to x along K so the
    # kernel does a single fused GEMM against W_aug.
    u = jnp.einsum('bk,ikr->bir', x, lora_As, precision=precision)      # [B,I,R]
    u_scaled = (u * adapter_mapping[:, :, None].astype(u.dtype))
    u_scaled = u_scaled.reshape(B, IR).astype(x.dtype)

    pieces = [x, u_scaled]
    pad_cols = K_aug - (K + IR)
    if pad_cols:
        pieces.append(jnp.zeros((B, pad_cols), x.dtype))
    x_aug = jnp.concatenate(pieces, axis=1)                              # [B,K_aug]

    q = _sublane_quantum(x.dtype)
    B_pad = _round_up(B, q)
    if B_pad != B:
        x_aug = jnp.pad(x_aug, ((0, B_pad - B), (0, 0)))

    # ---- tiling --------------------------------------------------------------
    tb = _pick_tile(B_pad, tile_b, q)
    # cap tn so the D (parallel) axis has >= 2 blocks -> both v7x TCs get work.
    pref_n = min(tile_n, D_pad // 2) if D_pad >= 2 * _LANE else D_pad
    tn = _pick_tile(D_pad, pref_n, _LANE)
    tk = _pick_tile(K_aug, tile_k, _LANE)

    if vmem_limit_bytes is None:
        vmem_limit_bytes = _default_vmem_limit()

    def kernel(x_ref, w_ref, b_ref, o_ref, acc_ref):
        @pl.when(pl.program_id(2) == 0)
        def _():
            acc_ref[...] = jnp.zeros_like(acc_ref)

        acc_ref[...] += jnp.dot(x_ref[...], w_ref[...],
                                preferred_element_type=jnp.float32,
                                precision=precision)

        @pl.when(pl.program_id(2) == pl.num_programs(2) - 1)
        def _():
            o_ref[...] = (acc_ref[...] + b_ref[...]).astype(o_ref.dtype)

    out = pl.pallas_call(
        kernel,
        out_shape=jax.ShapeDtypeStruct((B_pad, D_pad), x.dtype),
        grid_spec=pltpu.PrefetchScalarGridSpec(
            num_scalar_prefetch=0,
            grid=(D_pad // tn, B_pad // tb, K_aug // tk),   # K reduction last
            in_specs=[
                pl.BlockSpec((tb, tk), lambda j, b, k: (b, k)),   # x_aug tile
                pl.BlockSpec((tk, tn), lambda j, b, k: (k, j)),   # fused W/LoRA-B
                pl.BlockSpec((1, tn), lambda j, b, k: (0, j)),    # bias tile
            ],
            out_specs=pl.BlockSpec((tb, tn), lambda j, b, k: (b, j)),
            scratch_shapes=[pltpu.VMEM((tb, tn), jnp.float32)],
        ),
        compiler_params=pltpu.CompilerParams(
            dimension_semantics=("parallel", "parallel", "arbitrary"),
            vmem_limit_bytes=vmem_limit_bytes),
    )(x_aug, w_aug, bias2d)

    if B_pad != B or D_pad != D:
        out = out[:B, :D]

    # world_size == 1: gather_from_tensor_model_parallel_region is the identity.
    output_bias = None  # skip_bias_add=False -> bias already folded into output
    return out, output_bias


def _ref_forward(x, weight, bias, am, lA, lB):
    base = jnp.dot(x, weight.T, precision=lax.Precision.HIGHEST) + bias
    lora = jnp.einsum('bk,bi,ikr,ird->bd', x, am, lA, lB,
                      precision=lax.Precision.HIGHEST)
    return base + lora


if __name__ == "__main__":
    key = jax.random.PRNGKey(0)
    B, K, D = 8, 128, 256          # batch, in_features, out_features (per partition)
    I, max_r = 2, 4                # num active adapters, per-projection rank
    R = 3 * max_r                  # q/k/v ranks concatenated

    k1, k2, k3, k4, k5 = jax.random.split(key, 5)
    # xavier_normal_ init for weight [out_features, in_features]
    std = (2.0 / (K + D)) ** 0.5
    weight = jax.random.normal(k1, (D, K), jnp.float32) * std
    bias = jnp.zeros((D,), jnp.float32)            # ColumnParallelLinear zeros bias
    x = jax.random.normal(k2, (B, K), jnp.float32)
    lora_As = jax.random.normal(k3, (I, K, R), jnp.float32)        # torch.randn-like
    lora_Bs = jax.random.normal(k4, (I, R, D), jnp.float32) * 0.1
    adapter_ids = jax.random.randint(k5, (B,), 0, I)
    adapter_mapping = jax.nn.one_hot(adapter_ids, I, dtype=jnp.float32)

    # f32 path: strict correctness check (HIGHEST precision in-kernel).
    params = prepare_qkv_lora_params(weight, bias, lora_As, lora_Bs)
    out, out_bias = qkv_lora_column_parallel_linear(x, adapter_mapping, params)
    out = jax.block_until_ready(out)

    ref = _ref_forward(x, weight, bias, adapter_mapping, lora_As, lora_Bs)
    assert out.shape == (B, D) and out_bias is None
    assert out.dtype == x.dtype
    np.testing.assert_allclose(np.asarray(out), np.asarray(ref),
                               atol=1e-3, rtol=1e-3)

    # bf16 weights/activations path (HBM-bandwidth optimization, f32 accumulate).
    params_bf16 = prepare_qkv_lora_params(weight.astype(jnp.bfloat16),
                                          bias.astype(jnp.bfloat16),
                                          lora_As.astype(jnp.bfloat16),
                                          lora_Bs.astype(jnp.bfloat16))
    out_bf16, _ = qkv_lora_column_parallel_linear(
        x.astype(jnp.bfloat16), adapter_mapping.astype(jnp.bfloat16), params_bf16)
    out_bf16 = jax.block_until_ready(out_bf16)
    assert out_bf16.shape == (B, D) and out_bf16.dtype == jnp.bfloat16
    assert np.max(np.abs(np.asarray(out_bf16, dtype=np.float32)
                         - np.asarray(ref))) < 0.5

    print("KERNEL_OK")
</pallas_src>

<mosaic_0001>
module attributes {stable_mosaic.version = 11 : i64} {
  func.func @kernel(%arg0: i32, %arg1: i32, %arg2: i32, %arg3: memref<8x256xf32, #tpu.memory_space<vmem>>, %arg4: memref<256x128xf32, #tpu.memory_space<vmem>>, %arg5: memref<1x128xf32, #tpu.memory_space<vmem>>, %arg6: memref<8x128xf32, #tpu.memory_space<vmem>>, %arg7: memref<8x128xf32, #tpu.memory_space<vmem>>) attributes {dimension_semantics = [#tpu.dimension_semantics<parallel>, #tpu.dimension_semantics<parallel>, #tpu.dimension_semantics<arbitrary>], iteration_bounds = array<i64: 2, 1, 1>, scalar_prefetch = 0 : i64, scratch_operands = 1 : i64, tpu.core_type = #tpu.core_type<tc>, window_params = [{transform_indices = @transform_0, window_bounds = array<i64: 8, 256>}, {transform_indices = @transform_1, window_bounds = array<i64: 256, 128>}, {transform_indices = @transform_2, window_bounds = array<i64: 1, 128>}, {transform_indices = @transform_3, window_bounds = array<i64: 8, 128>}]} {
    %c0_i32 = arith.constant 0 : i32
    %0 = arith.cmpi eq, %arg2, %c0_i32 : i32
    %1 = arith.extui %0 : i1 to i32
    %c0_i32_0 = arith.constant 0 : i32
    %2 = arith.cmpi ne, %1, %c0_i32_0 : i32
    scf.if %2 {
      %cst_10 = arith.constant 0.000000e+00 : f32
      %12 = vector.broadcast %cst_10 : f32 to vector<8x128xf32>
      %c0_11 = arith.constant 0 : index
      %c0_12 = arith.constant 0 : index
      %13 = vector.load %arg7[%c0_11, %c0_12] : memref<8x128xf32, #tpu.memory_space<vmem>>, vector<8x128xf32>
      tpu.vector_store %arg7[%c0_11, %c0_12], %12 {strides = array<i32>} : memref<8x128xf32, #tpu.memory_space<vmem>>, vector<8x128xf32>,
    } else {
    }
    %c0 = arith.constant 0 : index
    %c0_1 = arith.constant 0 : index
    %3 = vector.load %arg7[%c0, %c0_1] : memref<8x128xf32, #tpu.memory_space<vmem>>, vector<8x128xf32>
    %c0_2 = arith.constant 0 : index
    %c0_3 = arith.constant 0 : index
    %4 = vector.load %arg3[%c0_2, %c0_3] : memref<8x256xf32, #tpu.memory_space<vmem>>, vector<8x256xf32>
    %c0_4 = arith.constant 0 : index
    %c0_5 = arith.constant 0 : index
    %5 = vector.load %arg4[%c0_4, %c0_5] : memref<256x128xf32, #tpu.memory_space<vmem>>, vector<256x128xf32>
    %cst = arith.constant dense<0.000000e+00> : vector<8x128xf32>
    %6 = tpu.matmul %4, %5, %cst {dimension_numbers = #tpu.dot_dimension_numbers<[1], [0], [0], [1], [0, 0, 1, 1], [], []>, precision = #tpu.contract_precision<fp32>} : vector<8x256xf32>, vector<256x128xf32>, vector<8x128xf32> -> vector<8x128xf32>
    %7 = arith.addf %3, %6 : vector<8x128xf32>
    %c0_6 = arith.constant 0 : index
    %c0_7 = arith.constant 0 : index
    %8 = vector.load %arg7[%c0_6, %c0_7] : memref<8x128xf32, #tpu.memory_space<vmem>>, vector<8x128xf32>
    tpu.vector_store %arg7[%c0_6, %c0_7], %7 {strides = array<i32>} : memref<8x128xf32, #tpu.memory_space<vmem>>, vector<8x128xf32>,
    %c0_i32_8 = arith.constant 0 : i32
    %9 = arith.cmpi eq, %arg2, %c0_i32_8 : i32
    %10 = arith.extui %9 : i1 to i32
    %c0_i32_9 = arith.constant 0 : i32
    %11 = arith.cmpi ne, %10, %c0_i32_9 : i32
    scf.if %11 {
      %c0_10 = arith.constant 0 : index
      %c0_11 = arith.constant 0 : index
      %12 = vector.load %arg7[%c0_10, %c0_11] : memref<8x128xf32, #tpu.memory_space<vmem>>, vector<8x128xf32>
      %c0_12 = arith.constant 0 : index
      %c0_13 = arith.constant 0 : index
      %13 = vector.load %arg5[%c0_12, %c0_13] : memref<1x128xf32, #tpu.memory_space<vmem>>, vector<1x128xf32>
      %14 = vector.broadcast %13 : vector<1x128xf32> to vector<8x128xf32>
      %15 = arith.addf %12, %14 : vector<8x128xf32>
      %c0_14 = arith.constant 0 : index
      %c0_15 = arith.constant 0 : index
      %16 = vector.load %arg6[%c0_14, %c0_15] : memref<8x128xf32, #tpu.memory_space<vmem>>, vector<8x128xf32>
      tpu.vector_store %arg6[%c0_14, %c0_15], %15 {strides = array<i32>} : memref<8x128xf32, #tpu.memory_space<vmem>>, vector<8x128xf32>,
    } else {
    }
    return
  }
  func.func @transform_0(%arg0: i32, %arg1: i32, %arg2: i32) -> (i32, i32) {
    %c0_i32 = arith.constant 0 : i32
    return %arg1, %arg2 : i32, i32
  }
  func.func @transform_1(%arg0: i32, %arg1: i32, %arg2: i32) -> (i32, i32) {
    %c0_i32 = arith.constant 0 : i32
    return %arg2, %arg0 : i32, i32
  }
  func.func @transform_2(%arg0: i32, %arg1: i32, %arg2: i32) -> (i32, i32) {
    %c0_i32 = arith.constant 0 : i32
    %c0_i32_0 = arith.constant 0 : i32
    return %c0_i32, %arg0 : i32, i32
  }
  func.func @transform_3(%arg0: i32, %arg1: i32, %arg2: i32) -> (i32, i32) {
    %c0_i32 = arith.constant 0 : i32
    return %arg1, %arg0 : i32, i32
  }
}

</mosaic_0001>

<bundles_post_ra>
// kernel: tpu_custom_call.1
= control target key start
LH: loop header
LB: loop body
LE: loop exit
PB: predicated region body
PF: predicated region fallthrough
CT: control target
= control target key end

     0   :  { %8 = vsyncpa [#allocation4], 0  ;;  %s2160_s0 = inlined_call_operand.hbm [shape: f32[8,256], index: 0, kind: input, shape index: {}]   ;;  %s2161_s1 = inlined_call_operand.hbm [shape: f32[256,256], index: 1, kind: input, shape index: {}]   ;;  %s2162_s2 = inlined_call_operand.hbm [shape: f32[1,256], index: 2, kind: input, shape index: {}]   ;;  %s2163_s3 = inlined_call_operand.hbm [shape: f32[8,256], index: 3, kind: output, shape index: {}]  }
   0x1   :  { %9 = vsyncpa [#allocation7], 0 }
   0x2   :  { %11 = vsyncpa [#allocation7 + $0x1], 0 }
   0x3   :  { %12 = vsyncpa [#allocation5], 0 }
   0x4   :  { %14 = vsyncpa [#allocation5 + $0x1], 0  ;;  %s1446_s12 = smov 0   ;;  %s1448_s13 = smov 0  }
   0x5   :  { %s1450_s14 = smov 0   ;;  %s1452_s15 = smov 0  }
   0x6   :  { %s1454_s16 = smov 0   ;;  %s1456_s17 = smov 0  }
   0x7 LB: > { %s39_s18 = sadd.s32 1, %s1416_s16  ;;  %s76_s19 = sadd.s32 1, %s1408_s14  ;;  %s1420_s17 = sphi %s1456_s17, %s20_s17   ;;  %s1416_s16 = sphi %s1454_s16, %s2229_s16   ;;  %s1412_s15 = sphi %s1452_s15, %s2228_s15   ;;  %s1408_s14 = sphi %s1450_s14, %s2227_s14   ;;  %s1404_s13 = sphi %s1448_s13, %s2226_s13   ;;  %s1400_s12 = sphi %s1446_s12, %s2225_s12  }
   0x8   : > { %p41_p0 = scmp.ge.s32.totalorder %s39_s18, 2  ;;  %p83_p1 = scmp.ne.s32.totalorder %s1408_s14, %s1404_s13 }
   0x9   : > { %p84_p2 = scmp.eq.s32.totalorder %s1420_s17, 0  ;;  %p1151_p3 = scmp.ge.s32.totalorder %s1420_s17, 2 }
   0xa   : > { %s2231_s18 = smov (%p41_p0, %s39_s18), 0  ;;  %p1188_p5 = scmp.lt.s32.totalorder %s1420_s17, 2 }
   0xb   : > { %p1487_p4 = por %p84_p2, %p83_p1  ;;  %s72_s21 = ssub.s32 %s1416_s16, %s2231_s18 }
   0xc   : > { %s184_s22 = sand.u32 1, %s1420_s17   ;;  %p74_p6 = scmp.eq.s32.totalorder %s72_s21, 0 }
   0xd   : > { %s186_s23 = sand.u32 1, %s1408_s14   ;;  %s1153_s24 = sshll.u32 %s1416_s16, 3 }
   0xe   : > { %s1498_s25 = scalar_select %p74_p6, %s1408_s14, %s76_s19  }
   0xf   : > { %s1152_s26 = sshll.u32 %s186_s23, 8  ;;  %s195_s29 = scalar_lea.hbm %s2161_s1, %s1153_s24 }
  0x10   : > { %s196_s30 = sshll.u32 %s195_s29, 4  ;;  %s188_s4 = scalar_lea.vmem [#allocation6], %s1152_s26  ;;  %s197_s30 = int_to_ptr.hbm [resolvable:$true] %s196_s30 }
  0x11   : > { %s198_s5 = sshll.u32 %s188_s4, 4  ;;  %p1509_p7 = pnand %p1188_p5, %p1487_p4  ;;  %s199_s5 = int_to_ptr.vmem [resolvable:$true] %s198_s5 }
  0x12   : > { %s1513_s7 = scalar_lea.sflag [#allocation7], %s184_s22  ;;  %s1422_s8 = smov 256  }
  0x13   : > { %s1423_s9 = smov 128   ;;  %s1424_s10 = smov 8  }
  0x14   : > { %1179 = dma.hbm_to_vmem [thread:$0]  (!%p1509_p7), %s197_s30, 4096, %s199_s5, %s1513_s7, %s1422_s8, %s1423_s9, %s1424_s10  }
  0x15   : > { %s1519_s11 = sadd.s32 4294967295, %s1420_s17   ;;  %s1148_s19 = sadd.s32 4294967294, %s1420_s17  }
  0x16   : > { %p89_p8 = scmp.ne.s32.totalorder %s1404_s13, %s1400_s12  ;;  %p90_p9 = scmp.eq.s32.totalorder %s1519_s11, 0 }
  0x17   : > { %p141_p10 = scmp.eq.s32.totalorder %s1519_s11, 1  ;;  %p147_p11 = scmp.eq.s32.totalorder %s1148_s19, 1 }
  0x18   : > { %p1528_p12 = por %p90_p9, %p89_p8  ;;  %p1149_p13 = scmp.ge.s32.totalorder %s1420_s17, 1 }
  0x19   : > { %p1536_p0 = por %p141_p10, %p83_p1  ;;  %p1540_p2 = por %p147_p11, %p89_p8 }
  0x1a   : > { %p154_p4 = scmp.lt.s32.totalorder %s1420_s17, 3  ;;  %s171_s27 = sshll.u32 %s2160_s0, 4  ;;  %s172_s27 = int_to_ptr.hbm [resolvable:$true] %s171_s27 }
  0x1b   : > { %s1425_s29 = smov [#allocation3]   ;;  %s214_s8 = scalar_lea.hbm %s2162_s2, %s1416_s16 }
  0x1c   : > { %p1548_p5 = pnand %p1149_p13, %p154_p4  ;;  %s173_s30 = sshll.u32 %s1425_s29, 4  ;;  %s174_s30 = int_to_ptr.vmem [resolvable:$true] %s173_s30 }
  0x1d   : > { %s211_s9 = scalar_lea.vmem [#allocation8], %s186_s23  ;;  %s216_s19 = sshll.u32 %s214_s8, 4  ;;  %s217_s19 = int_to_ptr.hbm [resolvable:$true] %s216_s19 }
  0x1e   : > { %p1172_p1 = pneg %p1548_p5  ;;  %s218_s10 = sshll.u32 %s211_s9, 4  ;;  %s219_s10 = int_to_ptr.vmem [resolvable:$true] %s218_s10 }
  0x1f   : > { %1182 = dma.hbm_to_vmem [thread:$0]  (!%p1509_p7), %s217_s19, 16, %s219_s10, %s1513_s7  }
  0x20   : > { %p1173_p6 = pnand %p1172_p1, %p90_p9  ;;  %227 = sbr.rel (%p1548_p5) target bundleno = 288 (0x120), region = 32 }
  0x22   : > { %1175 = dma.hbm_to_vmem [thread:$0]  (!%p1173_p6), %s172_s27, 256, %s174_s30, [#allocation4]  }
  0x25   : > { %1387 = dma.done.wait (%p90_p9), [#allocation4], 256  }
  0x26   : > { %1389 = vsyncadd (%p90_p9), [#allocation4], 4294967040  ;;  %s234_s23 = sand.u32 1, %s1519_s11   ;;  %s1573_s24 = sand.u32 1, %s1404_s13  }
  0x27   : > { %s1156_s26 = sshll.u32 %s1573_s24, 8  ;;  %s235_s27 = scalar_lea.sflag [#allocation7], %s234_s23 }
  0x28   : > { %s1576_s6 = scalar_lea.vmem [#allocation6], %s1156_s26 }
  0x29   : > { %1391 = dma.done.wait (%p1528_p12), %s235_s27, 4112  }
  0x2a   : > { %1393 = vsyncadd (%p1528_p12), %s235_s27, 4294963184  ;;  %v300_v0 = vld [vmem:[%s1576_s6 + $0x78] sm:$0xff]  ;;  %v299_v1 = vld [vmem:[%s1576_s6 + $0x70] sm:$0xff]  ;;  %s247_s7 = scalar_lea.vmem [#allocation8], %s1573_s24  ;;  %s1157_s11 = sshll.u32 %s1573_s24, 3 }
  0x2b   : > { %v298_v2 = vld [vmem:[%s1576_s6 + $0x68] sm:$0xff]  ;;  %v1585_v3 = vand.u32 4294901760, %v300_v0  ;;  %v1587_v4 = vand.u32 4294901760, %v299_v1  ;;  %v297_v6 = vld [vmem:[%s1576_s6 + $0x60] sm:$0xff]  ;;  %v296_v7 = vld [vmem:[%s1576_s6 + $0x58] sm:$0xff]  ;;  %s1159_s20 = sshll.u32 %s1412_s15, 3 }
  0x2c   : > { %v1589_v5 = vand.u32 4294901760, %v298_v2  ;;  %v295_v8 = vld [vmem:[%s1576_s6 + $0x50] sm:$0xff]  ;;  %v1594_v9 = vand.u32 4294901760, %v297_v6  ;;  %v1596_v10 = vand.u32 4294901760, %v296_v7  ;;  %v294_v12 = vld [vmem:[%s1576_s6 + $0x48] sm:$0xff]  ;;  %v293_v13 = vld [vmem:[%s1576_s6 + $0x40] sm:$0xff]  ;;  %s1024_s30 = scalar_lea.hbm %s2163_s3, %s1159_s20 }
  0x2d   : > { %v1598_v11 = vand.u32 4294901760, %v295_v8  ;;  %318 = vmatpush.msra.mxu0 %v1585_v3  ;;  %v1604_v14 = vsub.f32 %v300_v0, %v1585_v3  ;;  %v1607_v15 = vsub.f32 %v299_v1, %v1587_v4  ;;  %514 = vmatpush.msra.mxu3 %v1585_v3  ;;  %v1613_v17 = vand.u32 4294901760, %v294_v12  ;;  %v292_v18 = vld [vmem:[%s1576_s6 + $0x38] sm:$0xff]  ;;  %v291_v26 = vld [vmem:[%s1576_s6 + $0x30] sm:$0xff]  ;;  %v290_v34 = vld [vmem:[%s1576_s6 + $0x28] sm:$0xff]  ;;  %s274_s4 = scalar_lea.vmem [#allocation9], %s1157_s11 }
  0x2e   : > { %v1611_v16 = vsub.f32 %v298_v2, %v1589_v5  ;;  %v1617_v19 = vsub.f32 %v297_v6, %v1594_v9  ;;  %v1620_v20 = vsub.f32 %v296_v7, %v1596_v10  ;;  %v1630_v25 = vand.u32 4294901760, %v293_v13  ;;  %v289_v42 = vld [vmem:[%s1576_s6 + $0x20] sm:$0xff]  ;;  %v288_v48 = vld [vmem:[%s1576_s6 + $0x18] sm:$0xff]  ;;  %v287_v54 = vld [vmem:[%s1576_s6 + $0x10] sm:$0xff]  ;;  %s1026_s5 = sshll.u32 %s274_s4, 4  ;;  %s1028_s8 = sshll.u32 %s1024_s30, 4  ;;  %s1027_s5 = int_to_ptr.vmem [resolvable:$true] %s1026_s5  ;;  %s1029_s8 = int_to_ptr.hbm [resolvable:$true] %s1028_s8 }
  0x2f   : > { %v1623_v21 = vsub.f32 %v295_v8, %v1598_v11  ;;  %320 = vmatpush.msra.mxu0 %v1587_v4  ;;  %461 = vmatpush.msra.mxu2 %v1604_v14  ;;  %v360_v22 = vand.u32 4294901760, %v1604_v14  ;;  %v2179_v23 = vand.u32 4294901760, %v1607_v15  ;;  %v1635_v28 = vand.u32 4294901760, %v292_v18  ;;  %v316_v59 = vld [vmem:[%s1576_s6 + $0xf8] sm:$0xff]  ;;  %v286_v61 = vld [vmem:[%s1576_s6 + $0x8] sm:$0xff]  ;;  %v285_v2 = vld [vmem:[%s1576_s6] sm:$0xff] }
  0x30   : > { %v2177_v24 = vand.u32 4294901760, %v1611_v16  ;;  %516 = vmatpush.msra.mxu3 %v1587_v4  ;;  %v2176_v27 = vand.u32 4294901760, %v1617_v19  ;;  %v1638_v29 = vsub.f32 %v294_v12, %v1613_v17  ;;  %v2173_v33 = vand.u32 4294901760, %v1620_v20  ;;  %v315_v6 = vld [vmem:[%s1576_s6 + $0xf0] sm:$0xff]  ;;  %s1012_s15 = scalar_lea.sflag [#allocation5], %s1573_s24  ;;  %s1348_s9 = sshra.s32 %s1029_s8, 4  ;;  %s1349_s9 = int_to_ptr.hbm [resolvable:$true] %s1348_s9 }
  0x31   : > { %322 = vmatpush.msra.mxu0 %v1589_v5  ;;  %464 = vmatpush.msra.mxu2 %v1607_v15  ;;  %v361_v30 = vsub.f32 %v1604_v14, %v360_v22  ;;  %v367_v31 = vsub.f32 %v1607_v15, %v2179_v23  ;;  %v1654_v35 = vand.u32 4294901760, %v291_v26  ;;  %v2172_v36 = vand.u32 4294901760, %v1623_v21  ;;  %s1350_s10 = scalar_lea.hbm %s1349_s9, 8  ;;  %s1354_s26 = scalar_lea.hbm %s2163_s3, 16 }
  0x32   : > { %v373_v32 = vsub.f32 %v1611_v16, %v2177_v24  ;;  %518 = vmatpush.msra.mxu3 %v1589_v5  ;;  %v379_v39 = vsub.f32 %v1617_v19, %v2176_v27  ;;  %v1663_v40 = vsub.f32 %v293_v13, %v1630_v25  ;;  %v1666_v41 = vand.u32 4294901760, %v290_v34  ;;  %p1351_p7 = scmp.ne.s32.totalorder %s1349_s9, %s1350_s10  ;;  %p1355_p10 = scmp.lt.s32.totalorder %s1349_s9, %s2163_s3 }
  0x33   : > { %324 = vmatpush.msra.mxu0 %v1594_v9  ;;  %v362_v37 = vand.u32 4294901760, %v361_v30  ;;  %467 = vmatpush.msra.mxu2 %v1611_v16  ;;  %v368_v38 = vand.u32 4294901760, %v367_v31  ;;  %v385_v44 = vsub.f32 %v1620_v20, %v2173_v33  ;;  %v2170_v45 = vand.u32 4294901760, %v1638_v29  ;;  %p1356_p11 = scmp.lt.s32.totalorder %s1354_s26, %s1350_s10 }
  0x34   : > { %520 = vmatpush.msra.mxu3 %v1594_v9  ;;  %v374_v43 = vand.u32 4294901760, %v373_v32  ;;  %v1675_v46 = vsub.f32 %v292_v18, %v1635_v28  ;;  %v391_v47 = vsub.f32 %v1623_v21, %v2172_v36  ;;  %v380_v49 = vand.u32 4294901760, %v379_v39  ;;  %v314_v32 = vld [vmem:[%s1576_s6 + $0xe8] sm:$0xff]  ;;  %p1352_p8 = pnand %p1351_p7, %p1536_p0 }
  0x35   : > { %326 = vmatpush.msra.mxu0 %v1596_v10  ;;  %363 = vmatpush.msra.mxu1 %v362_v37  ;;  %v1684_v50 = vand.u32 4294901760, %v289_v42  ;;  %v2169_v51 = vand.u32 4294901760, %v1663_v40  ;;  %v1688_v52 = vsub.f32 %v291_v26, %v1654_v35  ;;  %v1693_v53 = vsub.f32 %v290_v34, %v1666_v41  ;;  %p1357_p12 = por %p1356_p11, %p1355_p10 }
  0x36   : > { %470 = vmatpush.msra.mxu2 %v1617_v19  ;;  %522 = vmatpush.msra.mxu3 %v1596_v10  ;;  %v386_v55 = vand.u32 4294901760, %v385_v44  ;;  %v397_v56 = vsub.f32 %v1638_v29, %v2170_v45  ;;  %v1700_v57 = vand.u32 4294901760, %v288_v48  ;;  %v2168_v58 = vand.u32 4294901760, %v1675_v46  ;;  %v313_v44 = vld [vmem:[%s1576_s6 + $0xe0] sm:$0xff]  ;;  %p1353_p9 = pneg %p1352_p8 }
  0x37   : > { %328 = vmatpush.msra.mxu0 %v1598_v11  ;;  %369 = vmatpush.msra.mxu1 %v368_v38  ;;  %v392_v60 = vand.u32 4294901760, %v391_v47  ;;  %v403_v62 = vsub.f32 %v1663_v40, %v2169_v51  ;;  %v1711_v63 = vand.u32 4294901760, %v287_v54  ;;  %v2166_v0 = vand.u32 4294901760, %v1688_v52  ;;  %v309_v45 = vld [vmem:[%s1576_s6 + $0xc0] sm:$0xff] }
  0x38   : > { %473 = vmatpush.msra.mxu2 %v1620_v20  ;;  %524 = vmatpush.msra.mxu3 %v1598_v11  ;;  %v1715_v1 = vsub.f32 %v289_v42, %v1684_v50  ;;  %v2165_v7 = vand.u32 4294901760, %v1693_v53  ;;  %v1722_v8 = vand.u32 4294901760, %v316_v59  ;;  %v398_v12 = vand.u32 4294901760, %v397_v56  ;;  %p1358_p13 = pnand %p1357_p12, %p1353_p9 }
  0x39   : > { %330 = vmatpush.msra.mxu0 %v1613_v17  ;;  %375 = vmatpush.msra.mxu1 %v374_v43  ;;  %v409_v13 = vsub.f32 %v1675_v46, %v2168_v58  ;;  %v1728_v18 = vand.u32 4294901760, %v286_v61  ;;  %v1731_v26 = vsub.f32 %v288_v48, %v1700_v57  ;;  %v1735_v30 = vand.u32 4294901760, %v285_v2 }
  0x3a   : > { %476 = vmatpush.msra.mxu2 %v1623_v21  ;;  %526 = vmatpush.msra.mxu3 %v1613_v17  ;;  %v1737_v31 = vand.u32 4294901760, %v315_v6  ;;  %v404_v34 = vand.u32 4294901760, %v403_v62  ;;  %v415_v37 = vsub.f32 %v1688_v52, %v2166_v0  ;;  %v2164_v38 = vand.u32 4294901760, %v1715_v1 }
  0x3b   : > { %332 = vmatpush.msra.mxu0 %v1630_v25  ;;  %381 = vmatpush.msra.mxu1 %v380_v49  ;;  %2190 = vst [vmem:[#allocation13_spill] sm:$0xff] %v1735_v30  ;;  %v1746_v39 = vsub.f32 %v287_v54, %v1711_v63  ;;  %v421_v42 = vsub.f32 %v1693_v53, %v2165_v7  ;;  %v410_v47 = vand.u32 4294901760, %v409_v13  ;;  %v2167_v48 = vand.u32 4294901760, %v1731_v26  ;;  %v311_v13 = vld [vmem:[%s1576_s6 + $0xd0] sm:$0xff] }
  0x3c   : > { %479 = vmatpush.msra.mxu2 %v1638_v29  ;;  %528 = vmatpush.msra.mxu3 %v1630_v25  ;;  %v1754_v43 = vsub.f32 %v316_v59, %v1722_v8  ;;  %v1760_v49 = vsub.f32 %v286_v61, %v1728_v18  ;;  %v1762_v54 = vand.u32 4294901760, %v314_v32  ;;  %v1770_v56 = vsub.f32 %v315_v6, %v1737_v31  ;;  %v312_v59 = vld [vmem:[%s1576_s6 + $0xd8] sm:$0xff] }
  0x3d   : > { %334 = vmatpush.msra.mxu0 %v1635_v28  ;;  %387 = vmatpush.msra.mxu1 %v386_v55  ;;  %v1767_v55 = vsub.f32 %v285_v2, %v1735_v30  ;;  %v427_v61 = vsub.f32 %v1715_v1, %v2164_v38  ;;  %v2171_v62 = vand.u32 4294901760, %v1746_v39  ;;  %v422_v2 = vand.u32 4294901760, %v421_v42  ;;  %v310_v42 = vld [vmem:[%s1576_s6 + $0xc8] sm:$0xff] }
  0x3e   : > { %482 = vmatpush.msra.mxu2 %v1663_v40  ;;  %530 = vmatpush.msra.mxu3 %v1635_v28  ;;  %v2174_v6 = vand.u32 4294901760, %v1754_v43  ;;  %v1790_v38 = vsub.f32 %v314_v32, %v1762_v54  ;;  %v1792_v7 = vand.u32 4294901760, %v312_v59  ;;  %v1806_v51 = vand.u32 4294901760, %v311_v13 }
  0x3f   : > { %336 = vmatpush.msra.mxu0 %v1654_v35  ;;  %393 = vmatpush.msra.mxu1 %v392_v60  ;;  %v416_v60 = vand.u32 4294901760, %v415_v37  ;;  %v2175_v37 = vand.u32 4294901760, %v1760_v49  ;;  %v2180_v0 = vand.u32 4294901760, %v1767_v55  ;;  %v439_v32 = vsub.f32 %v1746_v39, %v2171_v62 }
  0x40   : > { %485 = vmatpush.msra.mxu2 %v1675_v46  ;;  %532 = vmatpush.msra.mxu3 %v1654_v35  ;;  %v2181_v36 = vand.u32 4294901760, %v1790_v38  ;;  %v1822_v33 = vsub.f32 %v312_v59, %v1792_v7  ;;  %v1838_v24 = vsub.f32 %v311_v13, %v1806_v51 }
  0x41   : > { %338 = vmatpush.msra.mxu0 %v1666_v41  ;;  %399 = vmatpush.msra.mxu1 %v398_v12  ;;  %v1778_v12 = vand.u32 4294901760, %v313_v44  ;;  %v451_v59 = vsub.f32 %v1767_v55, %v2180_v0 }
  0x42   : > { %488 = vmatpush.msra.mxu2 %v1688_v52  ;;  %534 = vmatpush.msra.mxu3 %v1666_v41  ;;  %v714_v13 = vsub.f32 %v1790_v38, %v2181_v36 }
  0x43   : > { %340 = vmatpush.msra.mxu0 %v1684_v50  ;;  %405 = vmatpush.msra.mxu1 %v404_v34  ;;  %v433_v34 = vsub.f32 %v1731_v26, %v2167_v48  ;;  %v428_v48 = vand.u32 4294901760, %v427_v61  ;;  %v1804_v58 = vsub.f32 %v313_v44, %v1778_v12  ;;  %v1814_v61 = vand.u32 4294901760, %v310_v42 }
  0x44   : > { %491 = vmatpush.msra.mxu2 %v1693_v53  ;;  %536 = vmatpush.msra.mxu3 %v1684_v50  ;;  %v445_v44 = vsub.f32 %v1760_v49, %v2175_v37  ;;  %v440_v37 = vand.u32 4294901760, %v439_v32 }
  0x45   : > { %342 = vmatpush.msra.mxu0 %v1700_v57  ;;  %411 = vmatpush.msra.mxu1 %v410_v47  ;;  %v2178_v47 = vand.u32 4294901760, %v1770_v56  ;;  %v434_v62 = vand.u32 4294901760, %v433_v34  ;;  %v308_v34 = vld [vmem:[%s1576_s6 + $0xb8] sm:$0xff]  ;;  %v2182_v27 = vand.u32 4294901760, %v1804_v58  ;;  %v1844_v23 = vsub.f32 %v310_v42, %v1814_v61 }
  0x46   : > { %494 = vmatpush.msra.mxu2 %v1715_v1  ;;  %538 = vmatpush.msra.mxu3 %v1700_v57  ;;  %v446_v32 = vand.u32 4294901760, %v445_v44  ;;  %v1852_v14 = vand.u32 4294901760, %v308_v34  ;;  %v452_v44 = vand.u32 4294901760, %v451_v59  ;;  %v2193_v59 = vand.u32 4294901760, %v1822_v33 }
  0x47   : > { %344 = vmatpush.msra.mxu0 %v1711_v63  ;;  %417 = vmatpush.msra.mxu1 %v416_v60  ;;  %v702_v60 = vsub.f32 %v1754_v43, %v2174_v6  ;;  %v708_v6 = vsub.f32 %v1770_v56, %v2178_v47  ;;  %v720_v36 = vsub.f32 %v1804_v58, %v2182_v27 }
  0x48   : > { %497 = vmatpush.msra.mxu2 %v1731_v26  ;;  %540 = vmatpush.msra.mxu3 %v1711_v63  ;;  %v726_v27 = vsub.f32 %v1822_v33, %v2193_v59 }
  0x49   : > { %346 = vmatpush.msra.mxu0 %v1728_v18  ;;  %423 = vmatpush.msra.mxu1 %v422_v2  ;;  %v1829_v2 = vand.u32 4294901760, %v309_v45  ;;  %v703_v47 = vand.u32 4294901760, %v702_v60  ;;  %v709_v42 = vand.u32 4294901760, %v708_v6  ;;  %v306_v60 = vld [vmem:[%s1576_s6 + $0xa8] sm:$0xff]  ;;  %v305_v6 = vld [vmem:[%s1576_s6 + $0xa0] sm:$0xff] }
  0x4a   : > { %500 = vmatpush.msra.mxu2 %v1746_v39  ;;  %542 = vmatpush.msra.mxu3 %v1728_v18  ;;  %v1879_v0 = vand.u32 4294901760, %v306_v60 }
  0x4b   : > { %348 = vmatpush.msra.mxu0 %v1735_v30  ;;  %429 = vmatpush.msra.mxu1 %v428_v48  ;;  %v307_v48 = vld [vmem:[%s1576_s6 + $0xb0] sm:$0xff] }
  0x4c   : > { %503 = vmatpush.msra.mxu2 %v1760_v49  ;;  %544 = vmatpush.msra.mxu3 %v1735_v30  ;;  %v1877_v30 = vsub.f32 %v308_v34, %v1852_v14 }
  0x4d   : > { %555 = vmatpush.msrb.mxu0 %v360_v22  ;;  %435 = vmatpush.msra.mxu1 %v434_v62  ;;  %v2191_v22 = vand.u32 4294901760, %v1607_v15  ;;  %v1858_v62 = vsub.f32 %v309_v45, %v1829_v2  ;;  %v1866_v15 = vand.u32 4294901760, %v307_v48  ;;  %v1892_v45 = vand.u32 4294901760, %v305_v6 }
  0x4e   : > { %506 = vmatpush.msra.mxu2 %v1767_v55  ;;  %704 = vmatpush.msrb.mxu3 %v703_v47 }
  0x4f   : > { %559 = vmatpush.msrb.mxu0 %v2191_v22  ;;  %441 = vmatpush.msra.mxu1 %v440_v37  ;;  %v2192_v22 = vand.u32 4294901760, %v1611_v16  ;;  %v715_v37 = vand.u32 4294901760, %v714_v13  ;;  %v2194_v16 = vand.u32 4294901760, %v1617_v19  ;;  %v2195_v13 = vand.u32 4294901760, %v1838_v24 }
  0x50   : > { %659 = vmatpush.msrb.mxu2 %v1722_v8  ;;  %710 = vmatpush.msrb.mxu3 %v709_v42  ;;  %v1890_v34 = vsub.f32 %v307_v48, %v1866_v15  ;;  %v2196_v19 = vand.u32 4294901760, %v1620_v20  ;;  %v2197_v42 = vand.u32 4294901760, %v1844_v23  ;;  %v1903_v48 = vsub.f32 %v306_v60, %v1879_v0 }
  0x51   : > { %563 = vmatpush.msrb.mxu0 %v2192_v22  ;;  %447 = vmatpush.msra.mxu1 %v446_v32  ;;  %v304_v22 = vld [vmem:[%s1576_s6 + $0x98] sm:$0xff]  ;;  %v721_v32 = vand.u32 4294901760, %v720_v36  ;;  %v732_v59 = vsub.f32 %v1838_v24, %v2195_v13  ;;  %v283_v36 = vld [vmem:[#allocation3] sm:$0xff]  ;;  %v2198_v20 = vand.u32 4294901760, %v1623_v21  ;;  %v1917_v60 = vsub.f32 %v305_v6, %v1892_v45  ;;  %v301_v6 = vld [vmem:[%s1576_s6 + $0x80] sm:$0xff] }
  0x52   : > { %661 = vmatpush.msrb.mxu2 %v1737_v31  ;;  %716 = vmatpush.msrb.mxu3 %v715_v37  ;;  %v1905_v47 = vand.u32 4294901760, %v304_v22  ;;  %v1919_v13 = vand.u32 4294901760, %v283_v36  ;;  %v2200_v21 = vand.u32 4294901760, %v1638_v29  ;;  %v2202_v29 = vand.u32 4294901760, %v1663_v40 }
  0x53   : > { %567 = vmatpush.msrb.mxu0 %v2194_v16  ;;  %453 = vmatpush.msra.mxu1 %v452_v44  ;;  %v738_v44 = vsub.f32 %v1844_v23, %v2197_v42  ;;  %v727_v16 = vand.u32 4294901760, %v726_v27  ;;  %v303_v42 = vld [vmem:[%s1576_s6 + $0x90] sm:$0xff]  ;;  %v733_v27 = vand.u32 4294901760, %v732_v59  ;;  %v2204_v40 = vand.u32 4294901760, %v1675_v46 }
  0x54   : > { %663 = vmatpush.msrb.mxu2 %v1762_v54  ;;  %722 = vmatpush.msrb.mxu3 %v721_v32  ;;  %v2201_v32 = vand.u32 4294901760, %v1877_v30  ;;  %v1933_v37 = vsub.f32 %v304_v22, %v1905_v47  ;;  %v1963_v46 = vand.u32 4294901760, %v301_v6 }
  0x55   : > { %571 = vmatpush.msrb.mxu0 %v2196_v19  ;;  %622 = vmatpush.msrb.mxu1 %v1585_v3  ;;  %v2199_v3 = vand.u32 4294901760, %v1858_v62 }
  0x56   : > { %665 = vmatpush.msrb.mxu2 %v1778_v12  ;;  %728 = vmatpush.msrb.mxu3 %v727_v16  ;;  %v750_v59 = vsub.f32 %v1877_v30, %v2201_v32  ;;  %v1944_v32 = vsub.f32 %v283_v36, %v1919_v13 }
  0x57   : > { %575 = vmatpush.msrb.mxu0 %v2198_v20  ;;  %624 = vmatpush.msrb.mxu1 %v1587_v4  ;;  %v744_v19 = vsub.f32 %v1858_v62, %v2199_v3  ;;  %v739_v4 = vand.u32 4294901760, %v738_v44  ;;  %v302_v20 = vld [vmem:[%s1576_s6 + $0x88] sm:$0xff]  ;;  %v1930_v3 = vand.u32 4294901760, %v303_v42  ;;  %v2203_v44 = vand.u32 4294901760, %v1890_v34 }
  0x58   : > { %667 = vmatpush.msrb.mxu2 %v1792_v7  ;;  %734 = vmatpush.msrb.mxu3 %v733_v27  ;;  %v1946_v22 = vand.u32 4294901760, %v302_v20 }
  0x59   : > { %579 = vmatpush.msrb.mxu0 %v2200_v21  ;;  %626 = vmatpush.msrb.mxu1 %v1589_v5  ;;  %v745_v5 = vand.u32 4294901760, %v744_v19  ;;  %v756_v16 = vsub.f32 %v1890_v34, %v2203_v44  ;;  %v767_v21 = vand.u32 4294901760, %v1917_v60  ;;  %v2205_v19 = vand.u32 4294901760, %v1903_v48 }
  0x5a   : > { %669 = vmatpush.msrb.mxu2 %v1806_v51  ;;  %740 = vmatpush.msrb.mxu3 %v739_v4  ;;  %v1958_v36 = vsub.f32 %v303_v42, %v1930_v3  ;;  %v2206_v44 = vand.u32 4294901760, %v1688_v52  ;;  %v1971_v42 = vsub.f32 %v302_v20, %v1946_v22  ;;  %v2207_v52 = vand.u32 4294901760, %v1693_v53 }
  0x5b   : > { %583 = vmatpush.msrb.mxu0 %v2202_v29  ;;  %628 = vmatpush.msrb.mxu1 %v1594_v9  ;;  %v751_v9 = vand.u32 4294901760, %v750_v59  ;;  %v762_v27 = vsub.f32 %v1903_v48, %v2205_v19  ;;  %v773_v29 = vand.u32 4294901760, %v1933_v37  ;;  %v768_v4 = vsub.f32 %v1917_v60, %v767_v21 }
  0x5c   : > { %671 = vmatpush.msrb.mxu2 %v1814_v61  ;;  %746 = vmatpush.msrb.mxu3 %v745_v5  ;;  %v351_v59 = vand.u32 4294901760, %v1944_v32  ;;  %v2208_v19 = vand.u32 4294901760, %v1715_v1  ;;  %v1985_v53 = vsub.f32 %v301_v6, %v1963_v46  ;;  %v2210_v6 = vand.u32 4294901760, %v1746_v39 }
  0x5d   : > { %587 = vmatpush.msrb.mxu0 %v2204_v40  ;;  %630 = vmatpush.msrb.mxu1 %v1596_v10  ;;  %v757_v10 = vand.u32 4294901760, %v756_v16  ;;  %v763_v5 = vand.u32 4294901760, %v762_v27  ;;  %v774_v16 = vsub.f32 %v1933_v37, %v773_v29  ;;  %v779_v40 = vand.u32 4294901760, %v1958_v36 }
  0x5e   : > { %673 = vmatpush.msrb.mxu2 %v1829_v2  ;;  %752 = vmatpush.msrb.mxu3 %v751_v9  ;;  %v352_v20 = vsub.f32 %v1944_v32, %v351_v59  ;;  %v785_v9 = vand.u32 4294901760, %v1971_v42  ;;  %v2212_v39 = vand.u32 4294901760, %v1767_v55 }
  0x5f   : > { %591 = vmatpush.msrb.mxu0 %v2206_v44  ;;  %632 = vmatpush.msrb.mxu1 %v1598_v11  ;;  %v284_v11 = vld [vmem:[#allocation3 + $0x8] sm:$0xff]  ;;  %v2209_v44 = vand.u32 4294901760, %v1731_v26  ;;  %v780_v1 = vsub.f32 %v1958_v36, %v779_v40 }
  0x60   : > { %675 = vmatpush.msrb.mxu2 %v1852_v14  ;;  %758 = vmatpush.msrb.mxu3 %v757_v10  ;;  %v1990_v27 = vand.u32 4294901760, %v284_v11  ;;  %v791_v10 = vand.u32 4294901760, %v1985_v53  ;;  %v353_v26 = vand.u32 4294901760, %v352_v20 }
  0x61   : > { %595 = vmatpush.msrb.mxu0 %v2207_v52  ;;  %634 = vmatpush.msrb.mxu1 %v1613_v17  ;;  %v769_v17 = vand.u32 4294901760, %v768_v4  ;;  %v2211_v52 = vand.u32 4294901760, %v1760_v49 }
  0x62   : > { %677 = vmatpush.msrb.mxu2 %v1866_v15  ;;  %764 = vmatpush.msrb.mxu3 %v763_v5  ;;  %v2008_v4 = vsub.f32 %v284_v11, %v1990_v27  ;;  %v792_v5 = vsub.f32 %v1985_v53, %v791_v10 }
  0x63   : > { %599 = vmatpush.msrb.mxu0 %v2208_v19  ;;  %636 = vmatpush.msrb.mxu1 %v1630_v25  ;;  %v775_v25 = vand.u32 4294901760, %v774_v16 }
  0x64   : > { %679 = vmatpush.msrb.mxu2 %v1879_v0  ;;  %770 = vmatpush.msrb.mxu3 %v769_v17  ;;  %v692_v11 = vand.u32 4294901760, %v2008_v4 }
  0x65   : > { %603 = vmatpush.msrb.mxu0 %v2209_v44  ;;  %638 = vmatpush.msrb.mxu1 %v1635_v28  ;;  %v786_v28 = vsub.f32 %v1971_v42, %v785_v9 }
  0x66   : > { %681 = vmatpush.msrb.mxu2 %v1892_v45  ;;  %776 = vmatpush.msrb.mxu3 %v775_v25 }
  0x67   : > { %607 = vmatpush.msrb.mxu0 %v2210_v6  ;;  %640 = vmatpush.msrb.mxu1 %v1654_v35  ;;  %v781_v35 = vand.u32 4294901760, %v780_v1  ;;  %v787_v49 = vand.u32 4294901760, %v786_v28 }
  0x68   : > { %683 = vmatpush.msrb.mxu2 %v1905_v47  ;;  %354 = vmatmul.f32.vlgmr.msra.gmra.mxu0 %v353_v26 }
  0x69   : > { %611 = vmatpush.msrb.mxu0 %v2211_v52  ;;  %642 = vmatpush.msrb.mxu1 %v1666_v41  ;;  %v793_v41 = vand.u32 4294901760, %v792_v5 }
  0x6a   : > { %685 = vmatpush.msrb.mxu2 %v1930_v3  ;;  %782 = vmatpush.msrb.mxu3 %v781_v35 }
  0x6b   : > { %615 = vmatpush.msrb.mxu0 %v2212_v39  ;;  %644 = vmatpush.msrb.mxu1 %v1684_v50  ;;  %v693_v50 = vsub.f32 %v2008_v4, %v692_v11 }
  0x6c   : > { %687 = vmatpush.msrb.mxu2 %v1946_v22  ;;  %788 = vmatpush.msrb.mxu3 %v787_v49 }
  0x6d   : > { %802 = vmatpush.msra.mxu0 %v1754_v43  ;;  %646 = vmatpush.msrb.mxu1 %v1700_v57  ;;  %v2213_v57 = vand.u32 4294901760, %v1754_v43  ;;  %v694_v55 = vand.u32 4294901760, %v693_v50  ;;  %v2216_v43 = vand.u32 4294901760, %v1790_v38 }
  0x6e   : > { %509 = vmatmul.f32.vlgmr.msra.gmra.mxu2 %v1944_v32  ;;  %548 = vmatmul.f32.vlgmr.msra.gmra.mxu3 %v351_v59  ;;  %v2215_v32 = vld [vmem:[#allocation13_spill] sm:$0xff] }
  0x6f   : > { %805 = vmatpush.msra.mxu0 %v1770_v56  ;;  %648 = vmatpush.msrb.mxu1 %v1711_v63  ;;  %v2214_v63 = vand.u32 4294901760, %v1770_v56 }
  0x70   : > { %689 = vmatpush.msrb.mxu2 %v1963_v46  ;;  %794 = vmatpush.msrb.mxu3 %v793_v41 }
  0x71   : > { %808 = vmatpush.msra.mxu0 %v1790_v38  ;;  %650 = vmatpush.msrb.mxu1 %v1728_v18  ;;  %v2217_v18 = vand.u32 4294901760, %v1804_v58 }
  0x72   : > { %896 = vmatpush.msra.mxu2 %v2213_v57  ;;  %455 = vmatmul.f32.vlgmr.msra.gmra.mxu1 %v1919_v13 }
  0x73   : > { %811 = vmatpush.msra.mxu0 %v1804_v58  ;;  %963 = vmatpush.msra.mxu3 %v1722_v8  ;;  %v2219_v58 = vand.u32 4294901760, %v1838_v24 }
  0x74   : > { %900 = vmatpush.msra.mxu2 %v2214_v63  ;;  %652 = vmatpush.msrb.mxu1 %v2215_v32 }
  0x75   : > { %814 = vmatpush.msra.mxu0 %v1822_v33  ;;  %965 = vmatpush.msra.mxu3 %v1737_v31 }
  0x76   : > { %855 = vmatpush.msra.mxu1 %v1722_v8  ;;  %904 = vmatpush.msra.mxu2 %v2216_v43  ;;  %v2218_v8 = vand.u32 4294901760, %v1822_v33  ;;  %v2220_v33 = vand.u32 4294901760, %v1844_v23 }
  0x77   : > { %695 = vmatmul.f32.vlgmr.msrb.gmra.mxu2 %v694_v55  ;;  %817 = vmatpush.msra.mxu0 %v1838_v24  ;;  %v2222_v24 = vand.u32 4294901760, %v1877_v30 }
  0x78   : > { %857 = vmatpush.msra.mxu1 %v1737_v31  ;;  %908 = vmatpush.msra.mxu2 %v2217_v18  ;;  %v2221_v31 = vand.u32 4294901760, %v1858_v62 }
  0x79   : > { %967 = vmatpush.msra.mxu3 %v1762_v54  ;;  %617 = vmatmul.f32.vlgmr.msrb.gmra.mxu0 %v1919_v13 }
  0x7a   : > { %796 = vmatmul.f32.vlgmr.msrb.gmra.mxu3 %v1990_v27  ;;  %820 = vmatpush.msra.mxu0 %v1844_v23  ;;  %v2223_v23 = vand.u32 4294901760, %v1890_v34 }
  0x7b   : > { %859 = vmatpush.msra.mxu1 %v1762_v54  ;;  %912 = vmatpush.msra.mxu2 %v2218_v8 }
  0x7c   : > { %969 = vmatpush.msra.mxu3 %v1778_v12  ;;  %654 = vmatmul.f32.vlgmr.msrb.gmra.mxu1 %v1919_v13 }
  0x7d   : > { %823 = vmatpush.msra.mxu0 %v1858_v62  ;;  %861 = vmatpush.msra.mxu1 %v1778_v12 }
  0x7e   : > { %916 = vmatpush.msra.mxu2 %v2219_v58  ;;  %971 = vmatpush.msra.mxu3 %v1792_v7 }
  0x7f   : > { %826 = vmatpush.msra.mxu0 %v1877_v30  ;;  %863 = vmatpush.msra.mxu1 %v1792_v7 }
  0x80   : > { %920 = vmatpush.msra.mxu2 %v2220_v33  ;;  %973 = vmatpush.msra.mxu3 %v1806_v51 }
  0x81   : > { %829 = vmatpush.msra.mxu0 %v1890_v34  ;;  %865 = vmatpush.msra.mxu1 %v1806_v51  ;;  %v2224_v51 = vand.u32 4294901760, %v1903_v48 }
  0x82   : > { %924 = vmatpush.msra.mxu2 %v2221_v31  ;;  %975 = vmatpush.msra.mxu3 %v1814_v61 }
  0x83   : > { %832 = vmatpush.msra.mxu0 %v1903_v48  ;;  %867 = vmatpush.msra.mxu1 %v1814_v61 }
  0x84   : > { %928 = vmatpush.msra.mxu2 %v2222_v24  ;;  %977 = vmatpush.msra.mxu3 %v1829_v2 }
  0x85   : > { %835 = vmatpush.msra.mxu0 %v1917_v60  ;;  %869 = vmatpush.msra.mxu1 %v1829_v2 }
  0x86   : > { %932 = vmatpush.msra.mxu2 %v2223_v23  ;;  %979 = vmatpush.msra.mxu3 %v1852_v14 }
  0x87   : > { %838 = vmatpush.msra.mxu0 %v1933_v37  ;;  %871 = vmatpush.msra.mxu1 %v1852_v14 }
  0x88   : > { %936 = vmatpush.msra.mxu2 %v2224_v51  ;;  %981 = vmatpush.msra.mxu3 %v1866_v15 }
  0x89   : > { %841 = vmatpush.msra.mxu0 %v1958_v36  ;;  %873 = vmatpush.msra.mxu1 %v1866_v15 }
  0x8a   : > { %940 = vmatpush.msra.mxu2 %v767_v21  ;;  %983 = vmatpush.msra.mxu3 %v1879_v0 }
  0x8b   : > { %844 = vmatpush.msra.mxu0 %v1971_v42  ;;  %875 = vmatpush.msra.mxu1 %v1879_v0 }
  0x8c   : > { %944 = vmatpush.msra.mxu2 %v773_v29  ;;  %985 = vmatpush.msra.mxu3 %v1892_v45 }
  0x8d   : > { %847 = vmatpush.msra.mxu0 %v1985_v53  ;;  %877 = vmatpush.msra.mxu1 %v1892_v45 }
  0x8e   : > { %948 = vmatpush.msra.mxu2 %v779_v40  ;;  %987 = vmatpush.msra.mxu3 %v1905_v47 }
  0x8f   : > { %850 = vmatmul.f32.vlgmr.msra.gmra.mxu0 %v2008_v4  ;;  %879 = vmatpush.msra.mxu1 %v1905_v47 }
  0x90   : > { %952 = vmatpush.msra.mxu2 %v785_v9  ;;  %989 = vmatpush.msra.mxu3 %v1930_v3 }
  0x91   : > { %881 = vmatpush.msra.mxu1 %v1930_v3 }
  0x92   : > { %956 = vmatpush.msra.mxu2 %v791_v10  ;;  %991 = vmatpush.msra.mxu3 %v1946_v22 }
  0x93   : > { %958 = vmatmul.f32.vlgmr.msra.gmra.mxu2 %v1990_v27  ;;  %883 = vmatpush.msra.mxu1 %v1946_v22  ;;  %v1243_v22 = vld [vmem:[%s247_s7] ss:$0 sm:$0xff] }
  0x94   : > { %993 = vmatpush.msra.mxu3 %v1963_v46 }
  0x95   : > { %995 = vmatmul.f32.vlgmr.msra.gmra.mxu3 %v1990_v27  ;;  %885 = vmatpush.msra.mxu1 %v1963_v46 }
  0x96   : > { %889 = vmatmul.f32.vlgmr.msra.gmra.mxu1 %v692_v11 }
  0xe5   : > { %v355_v7 = vpop.f32.mrf.mxu0 }
  0xef   : > { %v456_v0 = vpop.f32.mrf.mxu1 }
  0xf0   : > { %v457_v30 = vadd.f32 %v456_v0, %v355_v7 }
  0xf1   : > { %v510_v38 = vpop.f32.mrf.mxu2  ;;  %v549_v56 = vpop.f32.mrf.mxu3 }
  0xf2   : > { %v511_v54 = vadd.f32 %v510_v38, %v457_v30 }
  0xf4   : > { %v550_v12 = vadd.f32 %v549_v56, %v511_v54 }
  0xf6   : > { %v618_v61 = vpop.f32.mrf.mxu0 }
  0xf7   : > { %v619_v2 = vadd.f32 %v618_v61, %v550_v12 }
  0xf9   : > { %v655_v14 = vpop.f32.mrf.mxu1 }
  0xfa   : > { %v656_v62 = vadd.f32 %v655_v14, %v619_v2  ;;  %v696_v15 = vpop.f32.mrf.mxu2 }
  0xfc   : > { %v697_v45 = vadd.f32 %v696_v15, %v656_v62 }
  0xfd   : > { %v797_v47 = vpop.f32.mrf.mxu3 }
  0xfe   : > { %v798_v13 = vadd.f32 %v797_v47, %v697_v45 }
 0x10c   : > { %v851_v34 = vpop.f32.mrf.mxu0 }
 0x10d   : > { %v852_v48 = vadd.f32 %v851_v34, %v798_v13 }
 0x113   : > { %v890_v37 = vpop.f32.mrf.mxu1 }
 0x114   : > { %v891_v60 = vadd.f32 %v890_v37, %v852_v48 }
 0x116   : > { %v959_v3 = vpop.f32.mrf.mxu2 }
 0x117   : > { %v960_v21 = vadd.f32 %v959_v3, %v891_v60 }
 0x118   : > { %v996_v29 = vpop.f32.mrf.mxu3 }
 0x119   : > { %v997_v36 = vadd.f32 %v996_v29, %v960_v21 }
 0x11b   : > { %v1009_v46 = vadd.f32 %v1243_v22, %v997_v36 }
 0x11d   : > { %1010 = vst [vmem:[%s274_s4] sm:$0xff] %v1009_v46 }
 0x11e   : > { %1361 = shalt.err (!%p1358_p13)
}
 0x11f   : > { %1170 = dma.vmem_to_hbm [thread:$0]  (%p1536_p0), %s1027_s5, 128, %s1029_s8, %s1012_s15  }
 0x120 PF: > { %s1040_s24 = sand.u32 1, %s1400_s12   ;;  %p1184_p4 = pnand %p1151_p3, %p1540_p2 }
 0x121   : > { %s1041_s7 = scalar_lea.sflag [#allocation5], %s1040_s24 }
 0x122   : > { %p1185_p5 = pneg %p1184_p4 }
 0x124   : > { %1395 = dma.done.wait (%p1185_p5), %s1041_s7, 128  }
 0x125   : > { %1397 = vsyncadd (%p1185_p5), %s1041_s7, 4294967168  ;;  %s20_s17 = sadd.s32 1, %s1420_s17   ;;  %s2225_s12 = smov %s1404_s13 }
 0x126   : > { %p17_p1 = scmp.ge.s32.totalorder %s20_s17, 4   ;;  %s2226_s13 = smov %s1408_s14 }
 0x127   : > { %s2227_s14 = smov %s1498_s25  ;;  %s2228_s15 = smov %s1416_s16 }
 0x128   : > { %s2229_s16 = smov %s2231_s18  ;;  %19 = sbr.rel (!%p17_p1) target bundleno = 7 (0x7), region = 102 }
 0x12d   :  { %1047 = vsyncpa [#allocation4], 1 }
 0x12e   :  { %1049 = vsyncpa [#allocation4 + $0x1], 1 }
 0x12f   :  { %1050 = vsyncpa [#allocation7], 1 }
 0x130   :  { %1052 = vsyncpa [#allocation7 + $0x1], 1 }
 0x131   :  { %1053 = vsyncpa [#allocation5], 1 }
 0x132   :  { %1055 = vsyncpa [#allocation5 + $0x1], 1 }

</bundles_post_ra>
